<compile_context>
chip_gen: v7x
topology: tpu7x:2x2x1
jax: 0.10.0
libtpu: 0.0.40
codegen_flags: <defaults>
</compile_context>

<pallas_src>
import functools

import jax
import jax.numpy as jnp
from jax.experimental import pallas as pl
from jax.experimental.pallas import tpu as pltpu

_LANES = 128
# 4096 rows x 128 lanes x 4 B = 2 MiB per f32 block.  Double-buffered input +
# output ~= 8 MiB of VMEM: fits v5e (16 MiB scoped default), v6e (32 MiB) and
# v7x (32 MiB scoped / 64 MiB physical) without touching vmem_limit_bytes.
_MAX_BLOCK_ROWS = 4096


def _tanh_kernel(x_ref, o_ref):
    # Elementwise tanh on a lane-dense tile -> EUP.  Cast in-vreg so a bf16
    # input slab halves input HBM traffic (v5e has no bf16 EUP, so always f32).
    o_ref[...] = jnp.tanh(x_ref[...].astype(jnp.float32))


def _tanh_slab(slab):
    """tanh over a (rows, 128) slab, returned as float32."""
    rows, lanes = slab.shape
    if rows <= _MAX_BLOCK_ROWS:
        tr = rows                 # block == full array dims (always legal)
    else:
        tr = _MAX_BLOCK_ROWS      # multiple of 8/16; last block may be partial
    grid = (pl.cdiv(rows, tr),)
    return pl.pallas_call(
        _tanh_kernel,
        out_shape=jax.ShapeDtypeStruct((rows, lanes), jnp.float32),
        grid=grid,
        in_specs=[pl.BlockSpec((tr, lanes), lambda i: (i, 0))],
        out_specs=pl.BlockSpec((tr, lanes), lambda i: (i, 0)),
        compiler_params=pltpu.CompilerParams(
            # "parallel" lets the row axis shard across v7x's two TensorCores;
            # on single-TC v5e/v6e it is a no-op.
            dimension_semantics=("parallel",)),
    )(slab)


@functools.partial(jax.jit, static_argnames=("min_pallas_elems",))
def crm_forward(x, *, min_pallas_elems=1 << 20):
    """CRM forward.  x: (B, 1, F, T, 2) real -> complex64 mask (B, F, T)."""
    B, C, Freq, T, two = x.shape
    assert C == 1, "torch.squeeze(mask, 1) assumes a singleton channel dim"
    assert two == 2, "last dim must hold (real, imag)"

    # Keep bf16 inputs as bf16 (fewer HBM bytes); anything else -> f32.
    if x.dtype not in (jnp.bfloat16, jnp.float32):
        x = x.astype(jnp.float32)

    n = B * Freq * T * 2

    if n < min_pallas_elems:
        # Small-input fast path: custom-call launch + layout plumbing would
        # dominate a tiny elementwise tanh; let XLA fuse it.
        m = jnp.tanh(x.astype(jnp.float32))[:, 0]
        return jax.lax.complex(m[..., 0], m[..., 1])

    # squeeze(dim=1) + flatten to a lane-dense slab (elementwise op: layout of
    # real/imag interleaving does not affect values).
    flat = x[:, 0].reshape(-1)
    rows = pl.cdiv(n, _LANES)
    pad = rows * _LANES - n
    if pad:
        # Only when n isn't a multiple of 128; tanh(0)=0 so padding is benign.
        flat = jnp.pad(flat, (0, pad))
    slab = flat.reshape(rows, _LANES)

    out = _tanh_slab(slab)

    mask = out.reshape(-1)
    if pad:
        mask = mask[:n]
    mask = mask.reshape(B, Freq, T, 2)
    # TODO(synk): complex dtypes are not supported inside TPU Pallas kernels;
    # the real+1j*imag combine happens here in the (jit-fused) wrapper.
    return jax.lax.complex(mask[..., 0], mask[..., 1])


if __name__ == "__main__":
    # Small shapes consistent with CRM usage: (batch, channel=1, freq, time, 2).
    B, Freq, T = 2, 16, 8
    key = jax.random.PRNGKey(0)
    x = jax.random.normal(key, (B, 1, Freq, T, 2), jnp.float32) * 2.0

    # Force the Pallas path even for this tiny test tensor.
    mask = crm_forward(x, min_pallas_elems=0)
    mask = jax.block_until_ready(mask)

    # Default path exercises the small-input fast path; pure-JAX reference.
    mask_fast = jax.block_until_ready(crm_forward(x))
    ref = jnp.tanh(x)[:, 0]
    ref = jax.lax.complex(ref[..., 0], ref[..., 1])

    assert mask.shape == (B, Freq, T), mask.shape
    assert mask.dtype == jnp.complex64, mask.dtype
    assert bool(jnp.all(jnp.isfinite(mask.real)))
    assert bool(jnp.all(jnp.isfinite(mask.imag)))
    assert bool(jnp.all(jnp.abs(mask.real) <= 1.0))
    assert bool(jnp.all(jnp.abs(mask.imag) <= 1.0))
    assert bool(jnp.allclose(mask, ref, atol=1e-6, rtol=1e-6))
    assert bool(jnp.allclose(mask_fast, ref, atol=1e-6, rtol=1e-6))

    print("KERNEL_OK")
</pallas_src>

<mosaic_0001>
module attributes {stable_mosaic.version = 11 : i64} {
  func.func @_tanh_kernel(%arg0: i32, %arg1: memref<4x128xf32, #tpu.memory_space<vmem>>, %arg2: memref<4x128xf32, #tpu.memory_space<vmem>>) attributes {dimension_semantics = [#tpu.dimension_semantics<parallel>], iteration_bounds = array<i64: 1>, scalar_prefetch = 0 : i64, scratch_operands = 0 : i64, tpu.core_type = #tpu.core_type<tc>, window_params = [{transform_indices = @transform_0, window_bounds = array<i64: 4, 128>}, {transform_indices = @transform_1, window_bounds = array<i64: 4, 128>}]} {
    %c0 = arith.constant 0 : index
    %c0_0 = arith.constant 0 : index
    %0 = vector.load %arg1[%c0, %c0_0] : memref<4x128xf32, #tpu.memory_space<vmem>>, vector<4x128xf32>
    %1 = math.tanh %0 : vector<4x128xf32>
    %c0_1 = arith.constant 0 : index
    %c0_2 = arith.constant 0 : index
    %2 = vector.load %arg2[%c0_1, %c0_2] : memref<4x128xf32, #tpu.memory_space<vmem>>, vector<4x128xf32>
    tpu.vector_store %arg2[%c0_1, %c0_2], %1 {strides = array<i32>} : memref<4x128xf32, #tpu.memory_space<vmem>>, vector<4x128xf32>,
    return
  }
  func.func @transform_0(%arg0: i32) -> (i32, i32) {
    %c0_i32 = arith.constant 0 : i32
    %c0_i32_0 = arith.constant 0 : i32
    return %arg0, %c0_i32 : i32, i32
  }
  func.func @transform_1(%arg0: i32) -> (i32, i32) {
    %c0_i32 = arith.constant 0 : i32
    %c0_i32_0 = arith.constant 0 : i32
    return %arg0, %c0_i32 : i32, i32
  }
}

</mosaic_0001>

<bundles_post_ra>
// kernel: squeeze.3
= control target key start
LH: loop header
LB: loop body
LE: loop exit
PB: predicated region body
PF: predicated region fallthrough
CT: control target
= control target key end

     0   :  { %vm5_vm0 = vcmask 1041409   ;;  %vm9_vm1 = vcmask 1042434   ;;  %vm13_vm2 = vcmask 1043459   ;;  %s1475_s30 = smov 126   ;;  %s1476_s8 = smov 122   ;;  %vm15_vm3 = vcmask 15360   ;;  %s2513_s0 = inlined_call_operand.vmem [shape: f32[2,1,16,8,2], index: 0, kind: input, shape index: {}]   ;;  %s2514_s1 = inlined_call_operand.vmem [shape: f32[4,128], index: 1, kind: output, shape index: {}]  }
   0x1   :  { %v1160_v0 = vld [vmem:[%s2513_s0 + $0x3f] sm:$0x1]   ;;  %v1168_v5 = vld [vmem:[%s2513_s0 + $0x3d] sm:$0x1]   ;;  %v1164_v11 = vld [vmem:[%s2513_s0 + $0x3e] sm:$0x1]  }
   0x2   :  { %v1161_v1 = vld [vmem:[%s2513_s0 + $0x7e] sm:$0x2]   ;;  %v1169_v6 = vld [vmem:[%s2513_s0 + $0x7c] sm:$0x2]   ;;  %v1165_v14 = vld [vmem:[%s2513_s0 + $0x7d] sm:$0x2]  }
   0x3   :  { %v1162_v2 = vld [vmem:[%s2513_s0 + $0xbd] sm:$0x4]   ;;  %v22_v4 = vsel %vm5_vm0, %v1161_v1, %v1160_v0  ;;  %v1170_v7 = vld [vmem:[%s2513_s0 + $0xbb] sm:$0x4]   ;;  %v58_v9 = vsel %vm5_vm0, %v1169_v6, %v1168_v5  ;;  %v1166_v15 = vld [vmem:[%s2513_s0 + $0xbc] sm:$0x4]   ;;  %v40_v18 = vsel %vm5_vm0, %v1165_v14, %v1164_v11 }
   0x4   :  { %v1163_v3 = vld [vmem:[%s2513_s0 + $0xfc] sm:$0x8]   ;;  %v26_v8 = vsel %vm9_vm1, %v1162_v2, %v22_v4  ;;  %v1171_v10 = vld [vmem:[%s2513_s0 + $0xfa] sm:$0x8]   ;;  %v62_v13 = vsel %vm9_vm1, %v1170_v7, %v58_v9  ;;  %v1167_v16 = vld [vmem:[%s2513_s0 + $0xfb] sm:$0x8]   ;;  %v44_v22 = vsel %vm9_vm1, %v1166_v15, %v40_v18 }
   0x5   :  { %v30_v12 = vsel %vm13_vm2, %v1163_v3, %v26_v8  ;;  %v66_v17 = vsel %vm13_vm2, %v1171_v10, %v62_v13  ;;  %v1172_v19 = vld [vmem:[%s2513_s0 + $0x3c] sm:$0x1]   ;;  %v1176_v25 = vld [vmem:[%s2513_s0 + $0x3b] sm:$0x1]   ;;  %v48_v26 = vsel %vm13_vm2, %v1167_v16, %v44_v22  ;;  %v1180_v33 = vld [vmem:[%s2513_s0 + $0x3a] sm:$0x1]  }
   0x6   :  { %31 = vrot.lane.b32.xlu0 %v30_v12, %s1475_s30  ;;  %v1173_v20 = vld [vmem:[%s2513_s0 + $0x7b] sm:$0x2]   ;;  %67 = vrot.lane.b32.xlu1 %v66_v17, %s1476_s8  ;;  %v1177_v28 = vld [vmem:[%s2513_s0 + $0x7a] sm:$0x2]   ;;  %s1477_s25 = smov 124   ;;  %s1478_s30 = smov 120  }
   0x7   :  { %v1174_v21 = vld [vmem:[%s2513_s0 + $0xba] sm:$0x4]   ;;  %v76_v23 = vsel %vm5_vm0, %v1173_v20, %v1172_v19  ;;  %v1178_v29 = vld [vmem:[%s2513_s0 + $0xb9] sm:$0x4]   ;;  %v94_v32 = vsel %vm5_vm0, %v1177_v28, %v1176_v25  ;;  %v1181_v34 = vld [vmem:[%s2513_s0 + $0x79] sm:$0x2]  }
   0x8   :  { %v1175_v24 = vld [vmem:[%s2513_s0 + $0xf9] sm:$0x8]   ;;  %v80_v27 = vsel %vm9_vm1, %v1174_v21, %v76_v23  ;;  %v1179_v30 = vld [vmem:[%s2513_s0 + $0xf8] sm:$0x8]   ;;  %v1182_v35 = vld [vmem:[%s2513_s0 + $0xb8] sm:$0x4]   ;;  %v98_v36 = vsel %vm9_vm1, %v1178_v29, %v94_v32  ;;  %v112_v37 = vsel %vm5_vm0, %v1181_v34, %v1180_v33 }
   0x9   :  { %v84_v31 = vsel %vm13_vm2, %v1175_v24, %v80_v27  ;;  %v1183_v38 = vld [vmem:[%s2513_s0 + $0xf7] sm:$0x8]   ;;  %v1184_v39 = vld [vmem:[%s2513_s0 + $0x39] sm:$0x1]   ;;  %v102_v40 = vsel %vm13_vm2, %v1179_v30, %v98_v36  ;;  %v116_v41 = vsel %vm9_vm1, %v1182_v35, %v112_v37  ;;  %v1188_v47 = vld [vmem:[%s2513_s0 + $0x38] sm:$0x1]  }
   0xa   :  { %49 = vrot.lane.b32.xlu0 %v48_v26, %s1477_s25  ;;  %85 = vrot.lane.b32.xlu1 %v84_v31, %s1478_s30  ;;  %v1185_v42 = vld [vmem:[%s2513_s0 + $0x78] sm:$0x2]   ;;  %v120_v45 = vsel %vm13_vm2, %v1183_v38, %v116_v41  ;;  %v1189_v48 = vld [vmem:[%s2513_s0 + $0x77] sm:$0x2]   ;;  %s1479_s18 = smov 118   ;;  %s1480_s23 = smov 116  }
   0xb   :  { %v1186_v43 = vld [vmem:[%s2513_s0 + $0xb7] sm:$0x4]   ;;  %v130_v46 = vsel %vm5_vm0, %v1185_v42, %v1184_v39  ;;  %v1190_v49 = vld [vmem:[%s2513_s0 + $0xb6] sm:$0x4]   ;;  %v148_v51 = vsel %vm5_vm0, %v1189_v48, %v1188_v47  ;;  %v1192_v53 = vld [vmem:[%s2513_s0 + $0x37] sm:$0x1]  }
   0xc   :  { %v1187_v44 = vld [vmem:[%s2513_s0 + $0xf6] sm:$0x8]   ;;  %v134_v50 = vsel %vm9_vm1, %v1186_v43, %v130_v46  ;;  %v1191_v52 = vld [vmem:[%s2513_s0 + $0xf5] sm:$0x8]   ;;  %v152_v54 = vsel %vm9_vm1, %v1190_v49, %v148_v51  ;;  %v1193_v55 = vld [vmem:[%s2513_s0 + $0x76] sm:$0x2]  }
   0xd   :  { %v1194_v56 = vld [vmem:[%s2513_s0 + $0xb5] sm:$0x4]   ;;  %v138_v57 = vsel %vm13_vm2, %v1187_v44, %v134_v50  ;;  %v166_v58 = vsel %vm5_vm0, %v1193_v55, %v1192_v53  ;;  %v1196_v59 = vld [vmem:[%s2513_s0 + $0x36] sm:$0x1]   ;;  %v156_v62 = vsel %vm13_vm2, %v1191_v52, %v152_v54  ;;  %v1200_v2 = vld [vmem:[%s2513_s0 + $0x35] sm:$0x1]  }
   0xe   :  { %103 = vrot.lane.b32.xlu0 %v102_v40, %s1479_s18  ;;  %121 = vrot.lane.b32.xlu1 %v120_v45, %s1480_s23  ;;  %v1197_v60 = vld [vmem:[%s2513_s0 + $0x75] sm:$0x2]   ;;  %v170_v63 = vsel %vm9_vm1, %v1194_v56, %v166_v58  ;;  %v1195_v0 = vld [vmem:[%s2513_s0 + $0xf4] sm:$0x8]   ;;  %s1481_s11 = smov 114   ;;  %s1482_s18 = smov 112  }
   0xf   :  { %v1198_v61 = vld [vmem:[%s2513_s0 + $0xb4] sm:$0x4]   ;;  %v184_v1 = vsel %vm5_vm0, %v1197_v60, %v1196_v59  ;;  %v1201_v5 = vld [vmem:[%s2513_s0 + $0x74] sm:$0x2]   ;;  %v1204_v8 = vld [vmem:[%s2513_s0 + $0x34] sm:$0x1]   ;;  %v174_v11 = vsel %vm13_vm2, %v1195_v0, %v170_v63 }
  0x10   :  { %v188_v3 = vsel %vm9_vm1, %v1198_v61, %v184_v1  ;;  %v1199_v4 = vld [vmem:[%s2513_s0 + $0xf3] sm:$0x8]   ;;  %v1202_v6 = vld [vmem:[%s2513_s0 + $0xb3] sm:$0x4]   ;;  %v202_v7 = vsel %vm5_vm0, %v1201_v5, %v1200_v2  ;;  %v1205_v9 = vld [vmem:[%s2513_s0 + $0x73] sm:$0x2]  }
  0x11   :  { %v1206_v10 = vld [vmem:[%s2513_s0 + $0xb2] sm:$0x4]   ;;  %v220_v12 = vsel %vm5_vm0, %v1205_v9, %v1204_v8  ;;  %v1208_v13 = vld [vmem:[%s2513_s0 + $0x33] sm:$0x1]   ;;  %v192_v14 = vsel %vm13_vm2, %v1199_v4, %v188_v3  ;;  %v206_v15 = vsel %vm9_vm1, %v1202_v6, %v202_v7  ;;  %v1203_v16 = vld [vmem:[%s2513_s0 + $0xf2] sm:$0x8]  }
  0x12   :  { %139 = vrot.lane.b32.xlu0 %v138_v57, %s1481_s11  ;;  %157 = vrot.lane.b32.xlu1 %v156_v62, %s1482_s18  ;;  %v1207_v17 = vld [vmem:[%s2513_s0 + $0xf1] sm:$0x8]   ;;  %v1209_v18 = vld [vmem:[%s2513_s0 + $0x72] sm:$0x2]   ;;  %v224_v19 = vsel %vm9_vm1, %v1206_v10, %v220_v12  ;;  %s1483_s4 = smov 110   ;;  %s1484_s9 = smov 108   ;;  %v210_v27 = vsel %vm13_vm2, %v1203_v16, %v206_v15 }
  0x13   :  { %v238_v20 = vsel %vm5_vm0, %v1209_v18, %v1208_v13  ;;  %v1210_v21 = vld [vmem:[%s2513_s0 + $0xb1] sm:$0x4]   ;;  %v1212_v22 = vld [vmem:[%s2513_s0 + $0x32] sm:$0x1]   ;;  %v1216_v26 = vld [vmem:[%s2513_s0 + $0x31] sm:$0x1]   ;;  %v228_v29 = vsel %vm13_vm2, %v1207_v17, %v224_v19 }
  0x14   :  { %v1213_v23 = vld [vmem:[%s2513_s0 + $0x71] sm:$0x2]   ;;  %v1217_v28 = vld [vmem:[%s2513_s0 + $0x70] sm:$0x2]   ;;  %v242_v30 = vsel %vm9_vm1, %v1210_v21, %v238_v20  ;;  %v1211_v31 = vld [vmem:[%s2513_s0 + $0xf0] sm:$0x8]  }
  0x15   :  { %v256_v24 = vsel %vm5_vm0, %v1213_v23, %v1212_v22  ;;  %v1214_v25 = vld [vmem:[%s2513_s0 + $0xb0] sm:$0x4]   ;;  %v1220_v32 = vld [vmem:[%s2513_s0 + $0x30] sm:$0x1]   ;;  %v274_v36 = vsel %vm5_vm0, %v1217_v28, %v1216_v26  ;;  %v1218_v37 = vld [vmem:[%s2513_s0 + $0xaf] sm:$0x4]   ;;  %v246_v42 = vsel %vm13_vm2, %v1211_v31, %v242_v30 }
  0x16   :  { %175 = vrot.lane.b32.xlu0 %v174_v11, %s1483_s4  ;;  %193 = vrot.lane.b32.xlu1 %v192_v14, %s1484_s9  ;;  %v1221_v33 = vld [vmem:[%s2513_s0 + $0x6f] sm:$0x2]   ;;  %v260_v34 = vsel %vm9_vm1, %v1214_v25, %v256_v24  ;;  %v1215_v35 = vld [vmem:[%s2513_s0 + $0xef] sm:$0x8]   ;;  %s1485_s22 = smov 106   ;;  %s1486_s29 = smov 104   ;;  %v278_v46 = vsel %vm9_vm1, %v1218_v37, %v274_v36 }
  0x17   :  { %v292_v38 = vsel %vm5_vm0, %v1221_v33, %v1220_v32  ;;  %v1222_v39 = vld [vmem:[%s2513_s0 + $0xae] sm:$0x4]   ;;  %v1224_v40 = vld [vmem:[%s2513_s0 + $0x2f] sm:$0x1]   ;;  %v1228_v43 = vld [vmem:[%s2513_s0 + $0x2e] sm:$0x1]   ;;  %v264_v45 = vsel %vm13_vm2, %v1215_v35, %v260_v34 }
  0x18   :  { %v1225_v41 = vld [vmem:[%s2513_s0 + $0x6e] sm:$0x2]   ;;  %v1229_v44 = vld [vmem:[%s2513_s0 + $0x6d] sm:$0x2]   ;;  %v1219_v47 = vld [vmem:[%s2513_s0 + $0xee] sm:$0x8]   ;;  %v296_v48 = vsel %vm9_vm1, %v1222_v39, %v292_v38 }
  0x19   :  { %v1223_v49 = vld [vmem:[%s2513_s0 + $0xed] sm:$0x8]   ;;  %v310_v50 = vsel %vm5_vm0, %v1225_v41, %v1224_v40  ;;  %v1226_v51 = vld [vmem:[%s2513_s0 + $0xad] sm:$0x4]   ;;  %s1487_s11 = smov 102   ;;  %v328_v52 = vsel %vm5_vm0, %v1229_v44, %v1228_v43  ;;  %s1488_s18 = smov 100   ;;  %v282_v56 = vsel %vm13_vm2, %v1219_v47, %v278_v46 }
  0x1a   :  { %211 = vrot.lane.b32.xlu0 %v210_v27, %s1485_s22  ;;  %229 = vrot.lane.b32.xlu1 %v228_v29, %s1486_s29  ;;  %v1230_v53 = vld [vmem:[%s2513_s0 + $0xac] sm:$0x4]   ;;  %v1232_v54 = vld [vmem:[%s2513_s0 + $0x2d] sm:$0x1]   ;;  %v300_v59 = vsel %vm13_vm2, %v1223_v49, %v296_v48  ;;  %v314_v60 = vsel %vm9_vm1, %v1226_v51, %v310_v50  ;;  %s1489_s29 = smov 98   ;;  %s1490_s7 = smov 96  }
  0x1b   :  { %v1233_v55 = vld [vmem:[%s2513_s0 + $0x6c] sm:$0x2]   ;;  %v1236_v57 = vld [vmem:[%s2513_s0 + $0x2c] sm:$0x1]   ;;  %v1227_v61 = vld [vmem:[%s2513_s0 + $0xec] sm:$0x8]   ;;  %v332_v62 = vsel %vm9_vm1, %v1230_v53, %v328_v52 }
  0x1c   :  { %v1237_v58 = vld [vmem:[%s2513_s0 + $0x6b] sm:$0x2]   ;;  %v1231_v63 = vld [vmem:[%s2513_s0 + $0xeb] sm:$0x8]   ;;  %v346_v0 = vsel %vm5_vm0, %v1233_v55, %v1232_v54  ;;  %v1234_v1 = vld [vmem:[%s2513_s0 + $0xab] sm:$0x4]   ;;  %v318_v6 = vsel %vm13_vm2, %v1227_v61, %v314_v60 }
  0x1d   :  { %v364_v2 = vsel %vm5_vm0, %v1237_v58, %v1236_v57  ;;  %v1238_v3 = vld [vmem:[%s2513_s0 + $0xaa] sm:$0x4]   ;;  %v1240_v4 = vld [vmem:[%s2513_s0 + $0x2b] sm:$0x1]   ;;  %v1244_v7 = vld [vmem:[%s2513_s0 + $0x2a] sm:$0x1]   ;;  %v336_v9 = vsel %vm13_vm2, %v1231_v63, %v332_v62  ;;  %v350_v10 = vsel %vm9_vm1, %v1234_v1, %v346_v0 }
  0x1e   :  { %247 = vrot.lane.b32.xlu0 %v246_v42, %s1487_s11  ;;  %265 = vrot.lane.b32.xlu1 %v264_v45, %s1488_s18  ;;  %v1241_v5 = vld [vmem:[%s2513_s0 + $0x6a] sm:$0x2]   ;;  %v1245_v8 = vld [vmem:[%s2513_s0 + $0x69] sm:$0x2]   ;;  %v368_v12 = vsel %vm9_vm1, %v1238_v3, %v364_v2  ;;  %s1491_s18 = smov 94   ;;  %s1492_s25 = smov 92  }
  0x1f   :  { %v1235_v11 = vld [vmem:[%s2513_s0 + $0xea] sm:$0x8]   ;;  %v1239_v13 = vld [vmem:[%s2513_s0 + $0xe9] sm:$0x8]   ;;  %v382_v14 = vsel %vm5_vm0, %v1241_v5, %v1240_v4  ;;  %v1242_v15 = vld [vmem:[%s2513_s0 + $0xa9] sm:$0x4]   ;;  %v400_v16 = vsel %vm5_vm0, %v1245_v8, %v1244_v7 }
  0x20   :  { %v1246_v17 = vld [vmem:[%s2513_s0 + $0xa8] sm:$0x4]   ;;  %v1248_v18 = vld [vmem:[%s2513_s0 + $0x29] sm:$0x1]   ;;  %v354_v20 = vsel %vm13_vm2, %v1235_v11, %v350_v10  ;;  %v1252_v21 = vld [vmem:[%s2513_s0 + $0x28] sm:$0x1]   ;;  %v372_v23 = vsel %vm13_vm2, %v1239_v13, %v368_v12  ;;  %v386_v24 = vsel %vm9_vm1, %v1242_v15, %v382_v14 }
  0x21   :  { %v1249_v19 = vld [vmem:[%s2513_s0 + $0x68] sm:$0x2]   ;;  %v1253_v22 = vld [vmem:[%s2513_s0 + $0x67] sm:$0x2]   ;;  %v1243_v25 = vld [vmem:[%s2513_s0 + $0xe8] sm:$0x8]   ;;  %v404_v26 = vsel %vm9_vm1, %v1246_v17, %v400_v16 }
  0x22   :  { %283 = vrot.lane.b32.xlu0 %v282_v56, %s1489_s29  ;;  %301 = vrot.lane.b32.xlu1 %v300_v59, %s1490_s7  ;;  %v1247_v27 = vld [vmem:[%s2513_s0 + $0xe7] sm:$0x8]   ;;  %v418_v28 = vsel %vm5_vm0, %v1249_v19, %v1248_v18  ;;  %v1250_v29 = vld [vmem:[%s2513_s0 + $0xa7] sm:$0x4]   ;;  %s1493_s7 = smov 90   ;;  %v436_v30 = vsel %vm5_vm0, %v1253_v22, %v1252_v21  ;;  %s1494_s14 = smov 88   ;;  %v390_v34 = vsel %vm13_vm2, %v1243_v25, %v386_v24 }
  0x23   :  { %v1254_v31 = vld [vmem:[%s2513_s0 + $0xa6] sm:$0x4]   ;;  %v1256_v32 = vld [vmem:[%s2513_s0 + $0x27] sm:$0x1]   ;;  %v1260_v35 = vld [vmem:[%s2513_s0 + $0x26] sm:$0x1]   ;;  %v408_v37 = vsel %vm13_vm2, %v1247_v27, %v404_v26  ;;  %v422_v38 = vsel %vm9_vm1, %v1250_v29, %v418_v28 }
  0x24   :  { %v1257_v33 = vld [vmem:[%s2513_s0 + $0x66] sm:$0x2]   ;;  %v1261_v36 = vld [vmem:[%s2513_s0 + $0x65] sm:$0x2]   ;;  %v1251_v39 = vld [vmem:[%s2513_s0 + $0xe6] sm:$0x8]   ;;  %v440_v40 = vsel %vm9_vm1, %v1254_v31, %v436_v30 }
  0x25   :  { %v1255_v41 = vld [vmem:[%s2513_s0 + $0xe5] sm:$0x8]   ;;  %v454_v42 = vsel %vm5_vm0, %v1257_v33, %v1256_v32  ;;  %v1258_v43 = vld [vmem:[%s2513_s0 + $0xa5] sm:$0x4]   ;;  %v472_v44 = vsel %vm5_vm0, %v1261_v36, %v1260_v35  ;;  %v1262_v45 = vld [vmem:[%s2513_s0 + $0xa4] sm:$0x4]   ;;  %v426_v48 = vsel %vm13_vm2, %v1251_v39, %v422_v38 }
  0x26   :  { %319 = vrot.lane.b32.xlu0 %v318_v6, %s1491_s18  ;;  %337 = vrot.lane.b32.xlu1 %v336_v9, %s1492_s25  ;;  %s1495_s25 = smov 86   ;;  %v1264_v46 = vld [vmem:[%s2513_s0 + $0x25] sm:$0x1]   ;;  %s1496_s3 = smov 84   ;;  %v1268_v49 = vld [vmem:[%s2513_s0 + $0x24] sm:$0x1]   ;;  %v444_v51 = vsel %vm13_vm2, %v1255_v41, %v440_v40  ;;  %v458_v52 = vsel %vm9_vm1, %v1258_v43, %v454_v42  ;;  %v476_v54 = vsel %vm9_vm1, %v1262_v45, %v472_v44 }
  0x27   :  { %v1265_v47 = vld [vmem:[%s2513_s0 + $0x64] sm:$0x2]   ;;  %v1269_v50 = vld [vmem:[%s2513_s0 + $0x63] sm:$0x2]   ;;  %v1259_v53 = vld [vmem:[%s2513_s0 + $0xe4] sm:$0x8]  }
  0x28   :  { %v1263_v55 = vld [vmem:[%s2513_s0 + $0xe3] sm:$0x8]   ;;  %v490_v56 = vsel %vm5_vm0, %v1265_v47, %v1264_v46  ;;  %v1266_v57 = vld [vmem:[%s2513_s0 + $0xa3] sm:$0x4]   ;;  %v508_v58 = vsel %vm5_vm0, %v1269_v50, %v1268_v49  ;;  %v1270_v59 = vld [vmem:[%s2513_s0 + $0xa2] sm:$0x4]   ;;  %v462_v62 = vsel %vm13_vm2, %v1259_v53, %v458_v52 }
  0x29   :  { %v1272_v60 = vld [vmem:[%s2513_s0 + $0x23] sm:$0x1]   ;;  %s1498_s21 = smov 80   ;;  %v1276_v63 = vld [vmem:[%s2513_s0 + $0x22] sm:$0x1]   ;;  %v480_v1 = vsel %vm13_vm2, %v1263_v55, %v476_v54  ;;  %v494_v2 = vsel %vm9_vm1, %v1266_v57, %v490_v56  ;;  %v512_v4 = vsel %vm9_vm1, %v1270_v59, %v508_v58  ;;  %s1500_s10 = smov 76  }
  0x2a   :  { %355 = vrot.lane.b32.xlu0 %v354_v20, %s1493_s7  ;;  %373 = vrot.lane.b32.xlu1 %v372_v23, %s1494_s14  ;;  %s1497_s14 = smov 82   ;;  %v1273_v61 = vld [vmem:[%s2513_s0 + $0x62] sm:$0x2]   ;;  %v1277_v0 = vld [vmem:[%s2513_s0 + $0x61] sm:$0x2]   ;;  %s1502_s28 = smov 72  }
  0x2b   :  { %v1267_v3 = vld [vmem:[%s2513_s0 + $0xe2] sm:$0x8]   ;;  %v1271_v5 = vld [vmem:[%s2513_s0 + $0xe1] sm:$0x8]   ;;  %v526_v6 = vsel %vm5_vm0, %v1273_v61, %v1272_v60  ;;  %v1274_v7 = vld [vmem:[%s2513_s0 + $0xa1] sm:$0x4]   ;;  %v544_v8 = vsel %vm5_vm0, %v1277_v0, %v1276_v63 }
  0x2c   :  { %v1278_v9 = vld [vmem:[%s2513_s0 + $0xa0] sm:$0x4]   ;;  %v1280_v10 = vld [vmem:[%s2513_s0 + $0x21] sm:$0x1]   ;;  %v498_v12 = vsel %vm13_vm2, %v1267_v3, %v494_v2  ;;  %v1284_v13 = vld [vmem:[%s2513_s0 + $0x20] sm:$0x1]   ;;  %v516_v15 = vsel %vm13_vm2, %v1271_v5, %v512_v4  ;;  %v530_v16 = vsel %vm9_vm1, %v1274_v7, %v526_v6 }
  0x2d   :  { %v1281_v11 = vld [vmem:[%s2513_s0 + $0x60] sm:$0x2]   ;;  %v1285_v14 = vld [vmem:[%s2513_s0 + $0x5f] sm:$0x2]   ;;  %v1275_v17 = vld [vmem:[%s2513_s0 + $0xe0] sm:$0x8]   ;;  %v548_v18 = vsel %vm9_vm1, %v1278_v9, %v544_v8 }
  0x2e   :  { %391 = vrot.lane.b32.xlu0 %v390_v34, %s1495_s25  ;;  %409 = vrot.lane.b32.xlu1 %v408_v37, %s1496_s3  ;;  %s1499_s3 = smov 78   ;;  %v1279_v19 = vld [vmem:[%s2513_s0 + $0xdf] sm:$0x8]   ;;  %v562_v20 = vsel %vm5_vm0, %v1281_v11, %v1280_v10  ;;  %v1282_v21 = vld [vmem:[%s2513_s0 + $0x9f] sm:$0x4]   ;;  %v580_v22 = vsel %vm5_vm0, %v1285_v14, %v1284_v13  ;;  %v534_v26 = vsel %vm13_vm2, %v1275_v17, %v530_v16  ;;  %s1504_s17 = smov 68  }
  0x2f   :  { %v1286_v23 = vld [vmem:[%s2513_s0 + $0x9e] sm:$0x4]   ;;  %v1288_v24 = vld [vmem:[%s2513_s0 + $0x1f] sm:$0x1]   ;;  %v1292_v27 = vld [vmem:[%s2513_s0 + $0x1e] sm:$0x1]   ;;  %v552_v29 = vsel %vm13_vm2, %v1279_v19, %v548_v18  ;;  %v566_v30 = vsel %vm9_vm1, %v1282_v21, %v562_v20 }
  0x30   :  { %v1289_v25 = vld [vmem:[%s2513_s0 + $0x5e] sm:$0x2]   ;;  %v1293_v28 = vld [vmem:[%s2513_s0 + $0x5d] sm:$0x2]   ;;  %v1283_v31 = vld [vmem:[%s2513_s0 + $0xde] sm:$0x8]   ;;  %v584_v32 = vsel %vm9_vm1, %v1286_v23, %v580_v22 }
  0x31   :  { %v1287_v33 = vld [vmem:[%s2513_s0 + $0xdd] sm:$0x8]   ;;  %v598_v34 = vsel %vm5_vm0, %v1289_v25, %v1288_v24  ;;  %v1290_v35 = vld [vmem:[%s2513_s0 + $0x9d] sm:$0x4]   ;;  %v616_v36 = vsel %vm5_vm0, %v1293_v28, %v1292_v27  ;;  %v1294_v37 = vld [vmem:[%s2513_s0 + $0x9c] sm:$0x4]   ;;  %v570_v40 = vsel %vm13_vm2, %v1283_v31, %v566_v30 }
  0x32   :  { %427 = vrot.lane.b32.xlu0 %v426_v48, %s1497_s14  ;;  %445 = vrot.lane.b32.xlu1 %v444_v51, %s1498_s21  ;;  %s1501_s21 = smov 74   ;;  %v1296_v38 = vld [vmem:[%s2513_s0 + $0x1d] sm:$0x1]   ;;  %v1300_v41 = vld [vmem:[%s2513_s0 + $0x1c] sm:$0x1]   ;;  %v588_v43 = vsel %vm13_vm2, %v1287_v33, %v584_v32  ;;  %v602_v44 = vsel %vm9_vm1, %v1290_v35, %v598_v34  ;;  %v620_v46 = vsel %vm9_vm1, %v1294_v37, %v616_v36  ;;  %s1506_s6 = smov 64  }
  0x33   :  { %v1297_v39 = vld [vmem:[%s2513_s0 + $0x5c] sm:$0x2]   ;;  %v1301_v42 = vld [vmem:[%s2513_s0 + $0x5b] sm:$0x2]   ;;  %v1291_v45 = vld [vmem:[%s2513_s0 + $0xdc] sm:$0x8]  }
  0x34   :  { %v1295_v47 = vld [vmem:[%s2513_s0 + $0xdb] sm:$0x8]   ;;  %v634_v48 = vsel %vm5_vm0, %v1297_v39, %v1296_v38  ;;  %v1298_v49 = vld [vmem:[%s2513_s0 + $0x9b] sm:$0x4]   ;;  %v652_v50 = vsel %vm5_vm0, %v1301_v42, %v1300_v41  ;;  %v1302_v51 = vld [vmem:[%s2513_s0 + $0x9a] sm:$0x4]   ;;  %v606_v54 = vsel %vm13_vm2, %v1291_v45, %v602_v44 }
  0x35   :  { %v1304_v52 = vld [vmem:[%s2513_s0 + $0x1b] sm:$0x1]   ;;  %v1308_v55 = vld [vmem:[%s2513_s0 + $0x1a] sm:$0x1]   ;;  %v624_v57 = vsel %vm13_vm2, %v1295_v47, %v620_v46  ;;  %v638_v58 = vsel %vm9_vm1, %v1298_v49, %v634_v48  ;;  %v1299_v59 = vld [vmem:[%s2513_s0 + $0xda] sm:$0x8]   ;;  %v656_v60 = vsel %vm9_vm1, %v1302_v51, %v652_v50 }
  0x36   :  { %463 = vrot.lane.b32.xlu0 %v462_v62, %s1499_s3  ;;  %481 = vrot.lane.b32.xlu1 %v480_v1, %s1500_s10  ;;  %s1503_s10 = smov 70   ;;  %v1305_v53 = vld [vmem:[%s2513_s0 + $0x5a] sm:$0x2]   ;;  %v1309_v56 = vld [vmem:[%s2513_s0 + $0x59] sm:$0x2]   ;;  %s1508_s24 = smov 60   ;;  %v642_v4 = vsel %vm13_vm2, %v1299_v59, %v638_v58 }
  0x37   :  { %v1303_v61 = vld [vmem:[%s2513_s0 + $0xd9] sm:$0x8]   ;;  %v670_v62 = vsel %vm5_vm0, %v1305_v53, %v1304_v52  ;;  %v1306_v63 = vld [vmem:[%s2513_s0 + $0x99] sm:$0x4]   ;;  %v688_v0 = vsel %vm5_vm0, %v1309_v56, %v1308_v55  ;;  %v1310_v1 = vld [vmem:[%s2513_s0 + $0x98] sm:$0x4]  }
  0x38   :  { %v1312_v2 = vld [vmem:[%s2513_s0 + $0x19] sm:$0x1]   ;;  %v1316_v5 = vld [vmem:[%s2513_s0 + $0x18] sm:$0x1]   ;;  %v660_v7 = vsel %vm13_vm2, %v1303_v61, %v656_v60  ;;  %v674_v8 = vsel %vm9_vm1, %v1306_v63, %v670_v62  ;;  %v1307_v9 = vld [vmem:[%s2513_s0 + $0xd8] sm:$0x8]   ;;  %v692_v10 = vsel %vm9_vm1, %v1310_v1, %v688_v0 }
  0x39   :  { %v1313_v3 = vld [vmem:[%s2513_s0 + $0x58] sm:$0x2]   ;;  %v1317_v6 = vld [vmem:[%s2513_s0 + $0x57] sm:$0x2]   ;;  %v1311_v11 = vld [vmem:[%s2513_s0 + $0xd7] sm:$0x8]   ;;  %v678_v18 = vsel %vm13_vm2, %v1307_v9, %v674_v8 }
  0x3a   :  { %499 = vrot.lane.b32.xlu0 %v498_v12, %s1501_s21  ;;  %517 = vrot.lane.b32.xlu1 %v516_v15, %s1502_s28  ;;  %s1505_s28 = smov 66   ;;  %v706_v12 = vsel %vm5_vm0, %v1313_v3, %v1312_v2  ;;  %v1314_v13 = vld [vmem:[%s2513_s0 + $0x97] sm:$0x4]   ;;  %v724_v14 = vsel %vm5_vm0, %v1317_v6, %v1316_v5  ;;  %v1318_v15 = vld [vmem:[%s2513_s0 + $0x96] sm:$0x4]   ;;  %s1510_s13 = smov 56   ;;  %v696_v21 = vsel %vm13_vm2, %v1311_v11, %v692_v10 }
  0x3b   :  { %v1320_v16 = vld [vmem:[%s2513_s0 + $0x17] sm:$0x1]   ;;  %v1324_v19 = vld [vmem:[%s2513_s0 + $0x16] sm:$0x1]   ;;  %v710_v22 = vsel %vm9_vm1, %v1314_v13, %v706_v12  ;;  %v1315_v23 = vld [vmem:[%s2513_s0 + $0xd6] sm:$0x8]   ;;  %v728_v24 = vsel %vm9_vm1, %v1318_v15, %v724_v14 }
  0x3c   :  { %v1321_v17 = vld [vmem:[%s2513_s0 + $0x56] sm:$0x2]   ;;  %v1325_v20 = vld [vmem:[%s2513_s0 + $0x55] sm:$0x2]   ;;  %v1319_v25 = vld [vmem:[%s2513_s0 + $0xd5] sm:$0x8]   ;;  %v714_v32 = vsel %vm13_vm2, %v1315_v23, %v710_v22 }
  0x3d   :  { %v1322_v27 = vld [vmem:[%s2513_s0 + $0x95] sm:$0x4]   ;;  %v760_v28 = vsel %vm5_vm0, %v1325_v20, %v1324_v19  ;;  %v1328_v30 = vld [vmem:[%s2513_s0 + $0x15] sm:$0x1]   ;;  %s1512_s2 = smov 52   ;;  %v732_v35 = vsel %vm13_vm2, %v1319_v25, %v728_v24  ;;  %s1514_s20 = smov 48  }
  0x3e   :  { %535 = vrot.lane.b32.xlu0 %v534_v26, %s1503_s10  ;;  %553 = vrot.lane.b32.xlu1 %v552_v29, %s1504_s17  ;;  %s1507_s17 = smov 62   ;;  %v742_v26 = vsel %vm5_vm0, %v1321_v17, %v1320_v16  ;;  %v1326_v29 = vld [vmem:[%s2513_s0 + $0x94] sm:$0x4]   ;;  %v1329_v31 = vld [vmem:[%s2513_s0 + $0x54] sm:$0x2]   ;;  %s1516_s11 = smov 44  }
  0x3f   :  { %v1332_v33 = vld [vmem:[%s2513_s0 + $0x14] sm:$0x1]   ;;  %v746_v36 = vsel %vm9_vm1, %v1322_v27, %v742_v26  ;;  %v1323_v37 = vld [vmem:[%s2513_s0 + $0xd4] sm:$0x8]   ;;  %v764_v38 = vsel %vm9_vm1, %v1326_v29, %v760_v28  ;;  %v1327_v39 = vld [vmem:[%s2513_s0 + $0xd3] sm:$0x8]  }
  0x40   :  { %v1333_v34 = vld [vmem:[%s2513_s0 + $0x53] sm:$0x2]   ;;  %v1330_v41 = vld [vmem:[%s2513_s0 + $0x93] sm:$0x4]   ;;  %v1336_v44 = vld [vmem:[%s2513_s0 + $0x13] sm:$0x1]   ;;  %v750_v46 = vsel %vm13_vm2, %v1323_v37, %v746_v36  ;;  %v768_v49 = vsel %vm13_vm2, %v1327_v39, %v764_v38 }
  0x41   :  { %v796_v42 = vsel %vm5_vm0, %v1333_v34, %v1332_v33  ;;  %v1337_v45 = vld [vmem:[%s2513_s0 + $0x52] sm:$0x2]   ;;  %v1340_v47 = vld [vmem:[%s2513_s0 + $0x12] sm:$0x1]   ;;  %v1331_v51 = vld [vmem:[%s2513_s0 + $0xd2] sm:$0x8]  }
  0x42   :  { %571 = vrot.lane.b32.xlu0 %v570_v40, %s1505_s28  ;;  %589 = vrot.lane.b32.xlu1 %v588_v43, %s1506_s6  ;;  %s1509_s6 = smov 58   ;;  %v778_v40 = vsel %vm5_vm0, %v1329_v31, %v1328_v30  ;;  %v1334_v43 = vld [vmem:[%s2513_s0 + $0x92] sm:$0x4]   ;;  %v1341_v48 = vld [vmem:[%s2513_s0 + $0x51] sm:$0x2]   ;;  %s1517_s28 = smov 42  }
  0x43   :  { %v782_v50 = vsel %vm9_vm1, %v1330_v41, %v778_v40  ;;  %v800_v52 = vsel %vm9_vm1, %v1334_v43, %v796_v42  ;;  %v1335_v53 = vld [vmem:[%s2513_s0 + $0xd1] sm:$0x8]   ;;  %v1338_v55 = vld [vmem:[%s2513_s0 + $0x91] sm:$0x4]   ;;  %v1342_v58 = vld [vmem:[%s2513_s0 + $0x90] sm:$0x4]  }
  0x44   :  { %v1339_v56 = vld [vmem:[%s2513_s0 + $0xd0] sm:$0x8]   ;;  %v1344_v59 = vld [vmem:[%s2513_s0 + $0x11] sm:$0x1]   ;;  %v786_v61 = vsel %vm13_vm2, %v1331_v51, %v782_v50  ;;  %v1348_v62 = vld [vmem:[%s2513_s0 + $0x10] sm:$0x1]   ;;  %v804_v1 = vsel %vm13_vm2, %v1335_v53, %v800_v52 }
  0x45   :  { %v1345_v60 = vld [vmem:[%s2513_s0 + $0x50] sm:$0x2]   ;;  %v1349_v63 = vld [vmem:[%s2513_s0 + $0x4f] sm:$0x2]   ;;  %v1158_v0 = vld [vmem:[%s2513_s0 + $0x7e] sm:$0x4]  }
  0x46   :  { %607 = vrot.lane.b32.xlu0 %v606_v54, %s1507_s17  ;;  %625 = vrot.lane.b32.xlu1 %v624_v57, %s1508_s24  ;;  %s1511_s24 = smov 54   ;;  %v814_v54 = vsel %vm5_vm0, %v1337_v45, %v1336_v44  ;;  %v832_v57 = vsel %vm5_vm0, %v1341_v48, %v1340_v47  ;;  %v1159_v3 = vld [vmem:[%s2513_s0 + $0xbd] sm:$0x8]   ;;  %v850_v8 = vsel %vm5_vm0, %v1345_v60, %v1344_v59  ;;  %v1346_v9 = vld [vmem:[%s2513_s0 + $0x8f] sm:$0x4]   ;;  %s1519_s17 = smov 38  }
  0x47   :  { %v818_v2 = vsel %vm9_vm1, %v1338_v55, %v814_v54  ;;  %v1157_v5 = vld [vmem:[%s2513_s0 + $0x3f] sm:$0x2]   ;;  %v836_v6 = vsel %vm9_vm1, %v1342_v58, %v832_v57  ;;  %v868_v11 = vsel %vm5_vm0, %v1349_v63, %v1348_v62  ;;  %v1350_v12 = vld [vmem:[%s2513_s0 + $0x8e] sm:$0x4]   ;;  %v1352_v13 = vld [vmem:[%s2513_s0 + $0xf] sm:$0x1]  }
  0x48   :  { %v1353_v14 = vld [vmem:[%s2513_s0 + $0x4e] sm:$0x2]   ;;  %v822_v16 = vsel %vm13_vm2, %v1339_v56, %v818_v2  ;;  %v1356_v17 = vld [vmem:[%s2513_s0 + $0xe] sm:$0x1]   ;;  %v1347_v22 = vld [vmem:[%s2513_s0 + $0xce] sm:$0x8]   ;;  %v872_v23 = vsel %vm9_vm1, %v1350_v12, %v868_v11 }
  0x49   :  { %v1351_v24 = vld [vmem:[%s2513_s0 + $0xcd] sm:$0x8]   ;;  %v886_v25 = vsel %vm5_vm0, %v1353_v14, %v1352_v13  ;;  %v1354_v26 = vld [vmem:[%s2513_s0 + $0x8d] sm:$0x4]   ;;  %v1358_v28 = vld [vmem:[%s2513_s0 + $0x8c] sm:$0x4]  }
  0x4a   :  { %643 = vrot.lane.b32.xlu0 %v642_v4, %s1509_s6  ;;  %661 = vrot.lane.b32.xlu1 %v660_v7, %s1510_s13  ;;  %s1513_s13 = smov 50   ;;  %v2_v4 = vld [vmem:[%s2513_s0] sm:$0x1]   ;;  %v1343_v7 = vld [vmem:[%s2513_s0 + $0xcf] sm:$0x8]   ;;  %s1518_s6 = smov 40   ;;  %v876_v34 = vsel %vm13_vm2, %v1351_v24, %v872_v23 }
  0x4b   :  { %v6_v10 = vsel %vm5_vm0, %v1157_v5, %v2_v4  ;;  %v840_v20 = vsel %vm13_vm2, %v1343_v7, %v836_v6  ;;  %v1360_v29 = vld [vmem:[%s2513_s0 + $0xd] sm:$0x1]   ;;  %v1365_v33 = vld [vmem:[%s2513_s0 + $0x4b] sm:$0x2]   ;;  %v1355_v36 = vld [vmem:[%s2513_s0 + $0xcc] sm:$0x8]  }
  0x4c   :  { %v10_v15 = vsel %vm9_vm1, %v1158_v0, %v6_v10  ;;  %v1361_v30 = vld [vmem:[%s2513_s0 + $0x4c] sm:$0x2]   ;;  %v1359_v38 = vld [vmem:[%s2513_s0 + $0xcb] sm:$0x8]   ;;  %v1366_v42 = vld [vmem:[%s2513_s0 + $0x8a] sm:$0x4]  }
  0x4d   :  { %v14_v19 = vsel %vm13_vm2, %v1159_v3, %v10_v15  ;;  %v922_v39 = vsel %vm5_vm0, %v1361_v30, %v1360_v29  ;;  %v1362_v40 = vld [vmem:[%s2513_s0 + $0x8b] sm:$0x4]   ;;  %v1368_v43 = vld [vmem:[%s2513_s0 + $0xb] sm:$0x1]   ;;  %v1373_v47 = vld [vmem:[%s2513_s0 + $0x49] sm:$0x2]  }
  0x4e   :  { %679 = vrot.lane.b32.xlu0 %v678_v18, %s1511_s24  ;;  %697 = vrot.lane.b32.xlu1 %v696_v21, %s1512_s2  ;;  %s1515_s2 = smov 46   ;;  %v1357_v18 = vld [vmem:[%s2513_s0 + $0x4d] sm:$0x2]   ;;  %v854_v21 = vsel %vm9_vm1, %v1346_v9, %v850_v8  ;;  %16 = vst.msk [vmem:[#allocation0] sm:$0xf] %vm15_vm3, %v14_v19   ;;  %s1520_s24 = smov 36  }
  0x4f   :  { %v904_v27 = vsel %vm5_vm0, %v1357_v18, %v1356_v17  ;;  %v858_v31 = vsel %vm13_vm2, %v1347_v22, %v854_v21  ;;  %v1369_v44 = vld [vmem:[%s2513_s0 + $0x4a] sm:$0x2]   ;;  %v1363_v50 = vld [vmem:[%s2513_s0 + $0xca] sm:$0x8]   ;;  %v1367_v52 = vld [vmem:[%s2513_s0 + $0xc9] sm:$0x8]  }
  0x50   :  { %v908_v37 = vsel %vm9_vm1, %v1358_v28, %v904_v27  ;;  %v958_v53 = vsel %vm5_vm0, %v1369_v44, %v1368_v43  ;;  %v1370_v54 = vld [vmem:[%s2513_s0 + $0x89] sm:$0x4]   ;;  %v1374_v56 = vld [vmem:[%s2513_s0 + $0x88] sm:$0x4]   ;;  %v1376_v57 = vld [vmem:[%s2513_s0 + $0x9] sm:$0x1]  }
  0x51   :  { %v912_v48 = vsel %vm13_vm2, %v1359_v38, %v908_v37  ;;  %v1377_v58 = vld [vmem:[%s2513_s0 + $0x48] sm:$0x2]   ;;  %v1380_v60 = vld [vmem:[%s2513_s0 + $0x8] sm:$0x1]   ;;  %v962_v63 = vsel %vm9_vm1, %v1370_v54, %v958_v53  ;;  %v1371_v0 = vld [vmem:[%s2513_s0 + $0xc8] sm:$0x8]  }
  0x52   :  { %715 = vrot.lane.b32.xlu0 %v714_v32, %s1513_s13  ;;  %733 = vrot.lane.b32.xlu1 %v732_v35, %s1514_s20  ;;  %v1364_v32 = vld [vmem:[%s2513_s0 + $0xc] sm:$0x1]   ;;  %v890_v35 = vsel %vm9_vm1, %v1354_v26, %v886_v25  ;;  %s1522_s13 = smov 32   ;;  %v1375_v2 = vld [vmem:[%s2513_s0 + $0xc7] sm:$0x8]   ;;  %v994_v3 = vsel %vm5_vm0, %v1377_v58, %v1376_v57  ;;  %s1526_s20 = smov 24   ;;  %v966_v9 = vsel %vm13_vm2, %v1371_v0, %v962_v63 }
  0x53   :  { %v940_v41 = vsel %vm5_vm0, %v1365_v33, %v1364_v32  ;;  %v894_v45 = vsel %vm13_vm2, %v1355_v36, %v890_v35  ;;  %v1378_v4 = vld [vmem:[%s2513_s0 + $0x87] sm:$0x4]   ;;  %v1382_v6 = vld [vmem:[%s2513_s0 + $0x86] sm:$0x4]   ;;  %v1384_v7 = vld [vmem:[%s2513_s0 + $0x7] sm:$0x1]  }
  0x54   :  { %v944_v51 = vsel %vm9_vm1, %v1366_v42, %v940_v41  ;;  %v1385_v8 = vld [vmem:[%s2513_s0 + $0x46] sm:$0x2]   ;;  %v1388_v10 = vld [vmem:[%s2513_s0 + $0x6] sm:$0x1]   ;;  %v998_v13 = vsel %vm9_vm1, %v1378_v4, %v994_v3  ;;  %v1379_v14 = vld [vmem:[%s2513_s0 + $0xc6] sm:$0x8]  }
  0x55   :  { %v948_v62 = vsel %vm13_vm2, %v1367_v52, %v944_v51  ;;  %v1389_v11 = vld [vmem:[%s2513_s0 + $0x45] sm:$0x2]   ;;  %v1030_v17 = vsel %vm5_vm0, %v1385_v8, %v1384_v7  ;;  %v1386_v18 = vld [vmem:[%s2513_s0 + $0x85] sm:$0x4]   ;;  %v1392_v21 = vld [vmem:[%s2513_s0 + $0x5] sm:$0x1]   ;;  %v1002_v23 = vsel %vm13_vm2, %v1379_v14, %v998_v13 }
  0x56   :  { %751 = vrot.lane.b32.xlu0 %v750_v46, %s1515_s2  ;;  %769 = vrot.lane.b32.xlu1 %v768_v49, %s1516_s11  ;;  %v1372_v46 = vld [vmem:[%s2513_s0 + $0xa] sm:$0x1]   ;;  %v926_v49 = vsel %vm9_vm1, %v1362_v40, %v922_v39  ;;  %s1524_s2 = smov 28   ;;  %v1048_v19 = vsel %vm5_vm0, %v1389_v11, %v1388_v10  ;;  %v1393_v22 = vld [vmem:[%s2513_s0 + $0x44] sm:$0x2]   ;;  %s1528_s9 = smov 20   ;;  %v1034_v27 = vsel %vm9_vm1, %v1386_v18, %v1030_v17 }
  0x57   :  { %v976_v55 = vsel %vm5_vm0, %v1373_v47, %v1372_v46  ;;  %v930_v59 = vsel %vm13_vm2, %v1363_v50, %v926_v49  ;;  %v1396_v24 = vld [vmem:[%s2513_s0 + $0x4] sm:$0x1]   ;;  %v1387_v28 = vld [vmem:[%s2513_s0 + $0xc4] sm:$0x8]   ;;  %v1391_v30 = vld [vmem:[%s2513_s0 + $0xc3] sm:$0x8]  }
  0x58   :  { %v1397_v25 = vld [vmem:[%s2513_s0 + $0x43] sm:$0x2]   ;;  %v1394_v32 = vld [vmem:[%s2513_s0 + $0x83] sm:$0x4]   ;;  %v1400_v35 = vld [vmem:[%s2513_s0 + $0x3] sm:$0x1]   ;;  %v1038_v37 = vsel %vm13_vm2, %v1387_v28, %v1034_v27 }
  0x59   :  { %v1084_v33 = vsel %vm5_vm0, %v1397_v25, %v1396_v24  ;;  %v1401_v36 = vld [vmem:[%s2513_s0 + $0x42] sm:$0x2]   ;;  %s1530_s27 = smov 16   ;;  %v1404_v38 = vld [vmem:[%s2513_s0 + $0x2] sm:$0x1]   ;;  %vm33_vm4 = vcmask 1048560  }
  0x5a   :  { %787 = vrot.lane.b32.xlu0 %v786_v61, %s1517_s28  ;;  %805 = vrot.lane.b32.xlu1 %v804_v1, %s1518_s6  ;;  %s1521_s6 = smov 34   ;;  %v1381_v61 = vld [vmem:[%s2513_s0 + $0x47] sm:$0x2]   ;;  %v980_v1 = vsel %vm9_vm1, %v1374_v56, %v976_v55  ;;  %v1405_v39 = vld [vmem:[%s2513_s0 + $0x41] sm:$0x2]   ;;  %s1532_s16 = smov 12  }
  0x5b   :  { %v1012_v5 = vsel %vm5_vm0, %v1381_v61, %v1380_v60  ;;  %v984_v12 = vsel %vm13_vm2, %v1375_v2, %v980_v1  ;;  %v1395_v42 = vld [vmem:[%s2513_s0 + $0xc2] sm:$0x8]   ;;  %v1399_v44 = vld [vmem:[%s2513_s0 + $0xc1] sm:$0x8]   ;;  %v1402_v46 = vld [vmem:[%s2513_s0 + $0x81] sm:$0x4]   ;;  %v1120_v47 = vsel %vm5_vm0, %v1405_v39, %v1404_v38 }
  0x5c   :  { %v1016_v15 = vsel %vm9_vm1, %v1382_v6, %v1012_v5  ;;  %v1408_v49 = vld [vmem:[%s2513_s0 + $0x1] sm:$0x1]   ;;  %v1403_v55 = vld [vmem:[%s2513_s0 + $0xc0] sm:$0x8]   ;;  %v1407_v58 = vld [vmem:[%s2513_s0 + $0xbf] sm:$0x8]  }
  0x5d   :  { %v1409_v50 = vld [vmem:[%s2513_s0 + $0x40] sm:$0x2]   ;;  %s1533_s23 = smov 10   ;;  %vm51_vm5 = vcmask 1032160   ;;  %vm69_vm6 = vcmask 1015760   ;;  %vm87_vm7 = vcmask 999360  }
  0x5e   :  { %823 = vrot.lane.b32.xlu0 %v822_v16, %s1519_s17  ;;  %841 = vrot.lane.b32.xlu1 %v840_v20, %s1520_s24  ;;  %s1523_s24 = smov 30   ;;  %v1383_v16 = vld [vmem:[%s2513_s0 + $0xc5] sm:$0x8]   ;;  %v1390_v20 = vld [vmem:[%s2513_s0 + $0x84] sm:$0x4]   ;;  %vm105_vm8 = vcmask 982960  }
  0x5f   :  { %v1020_v26 = vsel %vm13_vm2, %v1383_v16, %v1016_v15  ;;  %v1052_v29 = vsel %vm9_vm1, %v1390_v20, %v1048_v19  ;;  %v1410_v60 = vld [vmem:[%s2513_s0 + $0x7f] sm:$0x4]   ;;  %vm123_vm9 = vcmask 966560   ;;  %s1537_s28 = smov 2   ;;  %vm141_vm10 = vcmask 950160  }
  0x60   :  { %v1056_v40 = vsel %vm13_vm2, %v1391_v30, %v1052_v29  ;;  %v1411_v1 = vld [vmem:[%s2513_s0 + $0xbe] sm:$0x8]   ;;  %vm159_vm11 = vcmask 933760   ;;  %vm177_vm12 = vcmask 917360   ;;  %vm195_vm13 = vcmask 900960  }
  0x61   :  { %vm213_vm14 = vcmask 884560   ;;  %vm231_vm15 = vcmask 868160   ;;  %vm303_vm3 = vcmask 802560  }
  0x62   :  { %859 = vrot.lane.b32.xlu0 %v858_v31, %s1521_s6  ;;  %877 = vrot.lane.b32.xlu1 %v876_v34, %s1522_s13  ;;  %s1525_s13 = smov 26   ;;  %v1066_v31 = vsel %vm5_vm0, %v1393_v22, %v1392_v21  ;;  %v1398_v34 = vld [vmem:[%s2513_s0 + $0x82] sm:$0x4]  }
  0x63   :  { %v1070_v41 = vsel %vm9_vm1, %v1394_v32, %v1066_v31  ;;  %v1088_v43 = vsel %vm9_vm1, %v1398_v34, %v1084_v33 }
  0x64   :  { %v1074_v51 = vsel %vm13_vm2, %v1395_v42, %v1070_v41  ;;  %v1092_v53 = vsel %vm13_vm2, %v1399_v44, %v1088_v43 }
  0x66   :  { %895 = vrot.lane.b32.xlu0 %v894_v45, %s1523_s24  ;;  %913 = vrot.lane.b32.xlu1 %v912_v48, %s1524_s2  ;;  %s1527_s2 = smov 22   ;;  %v1102_v45 = vsel %vm5_vm0, %v1401_v36, %v1400_v35  ;;  %v1406_v48 = vld [vmem:[%s2513_s0 + $0x80] sm:$0x4]   ;;  %s1534_s24 = smov 8  }
  0x67   :  { %v1106_v54 = vsel %vm9_vm1, %v1402_v46, %v1102_v45  ;;  %v1124_v57 = vsel %vm9_vm1, %v1406_v48, %v1120_v47  ;;  %s1535_s0 = smov 6  }
  0x68   :  { %v1110_v61 = vsel %vm13_vm2, %v1403_v55, %v1106_v54  ;;  %v1128_v63 = vsel %vm13_vm2, %v1407_v58, %v1124_v57 }
  0x6a   :  { %931 = vrot.lane.b32.xlu0 %v930_v59, %s1525_s13  ;;  %949 = vrot.lane.b32.xlu1 %v948_v62, %s1526_s20  ;;  %s1529_s20 = smov 18   ;;  %v1138_v59 = vsel %vm5_vm0, %v1409_v50, %v1408_v49  ;;  %vm249_vm0 = vcmask 851760  }
  0x6b   :  { %v1142_v0 = vsel %vm9_vm1, %v1410_v60, %v1138_v59  ;;  %vm267_vm1 = vcmask 835360  }
  0x6c   :  { %v1146_v3 = vsel %vm13_vm2, %v1411_v1, %v1142_v0  ;;  %vm285_vm2 = vcmask 818960  }
  0x6e   :  { %967 = vrot.lane.b32.xlu0 %v966_v9, %s1527_s2  ;;  %985 = vrot.lane.b32.xlu1 %v984_v12, %s1528_s9  ;;  %s1531_s9 = smov 14  }
  0x72   :  { %1003 = vrot.lane.b32.xlu0 %v1002_v23, %s1529_s20  ;;  %1021 = vrot.lane.b32.xlu1 %v1020_v26, %s1530_s27  ;;  %s1536_s27 = smov 4  }
  0x76   :  { %1039 = vrot.lane.b32.xlu0 %v1038_v37, %s1531_s9  ;;  %1057 = vrot.lane.b32.xlu1 %v1056_v40, %s1532_s16 }
  0x78   :  { %v32_v52 = vpop.permute.xlu0 %31   ;;  %v68_v56 = vpop.permute.xlu1 %67  }
  0x79   :  { %34 = vst.msk [vmem:[#allocation0] sm:$0xf] %vm33_vm4, %v32_v52   ;;  %vm321_vm4 = vcmask 786160  }
  0x7a   :  { %1075 = vrot.lane.b32.xlu0 %v1074_v51, %s1533_s23  ;;  %1093 = vrot.lane.b32.xlu1 %v1092_v53, %s1534_s24 }
  0x7c   :  { %v50_v62 = vpop.permute.xlu0 %49   ;;  %v86_v2 = vpop.permute.xlu1 %85  }
  0x7d   :  { %52 = vst.msk [vmem:[#allocation0] sm:$0xf] %vm51_vm5, %v50_v62   ;;  %vm339_vm5 = vcmask 769760  }
  0x7e   :  { %70 = vst.msk [vmem:[#allocation0] sm:$0xf] %vm69_vm6, %v68_v56   ;;  %1111 = vrot.lane.b32.xlu0 %v1110_v61, %s1535_s0  ;;  %1129 = vrot.lane.b32.xlu1 %v1128_v63, %s1536_s27  ;;  %vm357_vm6 = vcmask 753360  }
  0x7f   :  { %88 = vst.msk [vmem:[#allocation0] sm:$0xf] %vm87_vm7, %v86_v2   ;;  %vm375_vm7 = vcmask 736960  }
  0x80   :  { %v104_v4 = vpop.permute.xlu0 %103   ;;  %v122_v5 = vpop.permute.xlu1 %121  }
  0x81   :  { %106 = vst.msk [vmem:[#allocation0] sm:$0xf] %vm105_vm8, %v104_v4   ;;  %vm393_vm8 = vcmask 720560  }
  0x82   :  { %1147 = vrot.lane.b32.xlu0 %v1146_v3, %s1537_s28  ;;  %124 = vst.msk [vmem:[#allocation0] sm:$0xf] %vm123_vm9, %v122_v5   ;;  %vm411_vm9 = vcmask 704160  }
  0x84   :  { %v140_v6 = vpop.permute.xlu0 %139   ;;  %v158_v7 = vpop.permute.xlu1 %157  }
  0x85   :  { %142 = vst.msk [vmem:[#allocation0] sm:$0xf] %vm141_vm10, %v140_v6   ;;  %vm429_vm10 = vcmask 687760  }
  0x86   :  { %160 = vst.msk [vmem:[#allocation0] sm:$0xf] %vm159_vm11, %v158_v7   ;;  %vm447_vm11 = vcmask 671360  }
  0x88   :  { %v176_v8 = vpop.permute.xlu0 %175   ;;  %v194_v9 = vpop.permute.xlu1 %193  }
  0x89   :  { %178 = vst.msk [vmem:[#allocation0] sm:$0xf] %vm177_vm12, %v176_v8   ;;  %vm465_vm12 = vcmask 654960  }
  0x8a   :  { %196 = vst.msk [vmem:[#allocation0] sm:$0xf] %vm195_vm13, %v194_v9   ;;  %vm483_vm13 = vcmask 638560  }
  0x8c   :  { %v212_v10 = vpop.permute.xlu0 %211   ;;  %v230_v11 = vpop.permute.xlu1 %229  }
  0x8d   :  { %214 = vst.msk [vmem:[#allocation0] sm:$0xf] %vm213_vm14, %v212_v10   ;;  %vm501_vm14 = vcmask 622160  }
  0x8e   :  { %232 = vst.msk [vmem:[#allocation0] sm:$0xf] %vm231_vm15, %v230_v11   ;;  %vm519_vm15 = vcmask 605760  }
  0x90   :  { %v248_v12 = vpop.permute.xlu0 %247   ;;  %v266_v13 = vpop.permute.xlu1 %265  }
  0x91   :  { %250 = vst.msk [vmem:[#allocation0] sm:$0xf] %vm249_vm0, %v248_v12   ;;  %vm537_vm0 = vcmask 589360  }
  0x92   :  { %268 = vst.msk [vmem:[#allocation0] sm:$0xf] %vm267_vm1, %v266_v13   ;;  %vm555_vm1 = vcmask 572960  }
  0x94   :  { %v284_v14 = vpop.permute.xlu0 %283   ;;  %v302_v15 = vpop.permute.xlu1 %301  }
  0x95   :  { %286 = vst.msk [vmem:[#allocation0] sm:$0xf] %vm285_vm2, %v284_v14   ;;  %vm573_vm2 = vcmask 556560  }
  0x96   :  { %304 = vst.msk [vmem:[#allocation0] sm:$0xf] %vm303_vm3, %v302_v15   ;;  %vm591_vm3 = vcmask 540160  }
  0x98   :  { %v320_v16 = vpop.permute.xlu0 %319   ;;  %v338_v17 = vpop.permute.xlu1 %337  }
  0x99   :  { %322 = vst.msk [vmem:[#allocation0] sm:$0xf] %vm321_vm4, %v320_v16   ;;  %vm609_vm4 = vcmask 523760  }
  0x9a   :  { %340 = vst.msk [vmem:[#allocation0] sm:$0xf] %vm339_vm5, %v338_v17   ;;  %vm627_vm5 = vcmask 507360  }
  0x9c   :  { %v356_v18 = vpop.permute.xlu0 %355   ;;  %v374_v19 = vpop.permute.xlu1 %373  }
  0x9d   :  { %358 = vst.msk [vmem:[#allocation0] sm:$0xf] %vm357_vm6, %v356_v18   ;;  %vm645_vm6 = vcmask 490960  }
  0x9e   :  { %376 = vst.msk [vmem:[#allocation0] sm:$0xf] %vm375_vm7, %v374_v19   ;;  %vm663_vm7 = vcmask 474560  }
  0xa0   :  { %v392_v20 = vpop.permute.xlu0 %391   ;;  %v410_v21 = vpop.permute.xlu1 %409  }
  0xa1   :  { %394 = vst.msk [vmem:[#allocation0] sm:$0xf] %vm393_vm8, %v392_v20   ;;  %vm681_vm8 = vcmask 458160  }
  0xa2   :  { %412 = vst.msk [vmem:[#allocation0] sm:$0xf] %vm411_vm9, %v410_v21   ;;  %vm699_vm9 = vcmask 441760  }
  0xa4   :  { %v428_v22 = vpop.permute.xlu0 %427   ;;  %v446_v23 = vpop.permute.xlu1 %445  }
  0xa5   :  { %430 = vst.msk [vmem:[#allocation0] sm:$0xf] %vm429_vm10, %v428_v22   ;;  %vm717_vm10 = vcmask 425360  }
  0xa6   :  { %448 = vst.msk [vmem:[#allocation0] sm:$0xf] %vm447_vm11, %v446_v23   ;;  %vm735_vm11 = vcmask 408960  }
  0xa8   :  { %v464_v24 = vpop.permute.xlu0 %463   ;;  %v482_v25 = vpop.permute.xlu1 %481  }
  0xa9   :  { %466 = vst.msk [vmem:[#allocation0] sm:$0xf] %vm465_vm12, %v464_v24   ;;  %vm753_vm12 = vcmask 392560  }
  0xaa   :  { %484 = vst.msk [vmem:[#allocation0] sm:$0xf] %vm483_vm13, %v482_v25   ;;  %vm771_vm13 = vcmask 376160  }
  0xac   :  { %v500_v26 = vpop.permute.xlu0 %499   ;;  %v518_v27 = vpop.permute.xlu1 %517  }
  0xad   :  { %502 = vst.msk [vmem:[#allocation0] sm:$0xf] %vm501_vm14, %v500_v26   ;;  %vm789_vm14 = vcmask 359760  }
  0xae   :  { %520 = vst.msk [vmem:[#allocation0] sm:$0xf] %vm519_vm15, %v518_v27   ;;  %vm807_vm15 = vcmask 343360  }
  0xb0   :  { %v536_v28 = vpop.permute.xlu0 %535   ;;  %v554_v29 = vpop.permute.xlu1 %553  }
  0xb1   :  { %538 = vst.msk [vmem:[#allocation0] sm:$0xf] %vm537_vm0, %v536_v28   ;;  %vm825_vm0 = vcmask 326960  }
  0xb2   :  { %556 = vst.msk [vmem:[#allocation0] sm:$0xf] %vm555_vm1, %v554_v29   ;;  %vm843_vm1 = vcmask 310560  }
  0xb4   :  { %v572_v30 = vpop.permute.xlu0 %571   ;;  %v590_v31 = vpop.permute.xlu1 %589  }
  0xb5   :  { %574 = vst.msk [vmem:[#allocation0] sm:$0xf] %vm573_vm2, %v572_v30   ;;  %vm861_vm2 = vcmask 294160  }
  0xb6   :  { %592 = vst.msk [vmem:[#allocation0] sm:$0xf] %vm591_vm3, %v590_v31   ;;  %vm879_vm3 = vcmask 277760  }
  0xb8   :  { %v608_v32 = vpop.permute.xlu0 %607   ;;  %v626_v33 = vpop.permute.xlu1 %625  }
  0xb9   :  { %610 = vst.msk [vmem:[#allocation0] sm:$0xf] %vm609_vm4, %v608_v32   ;;  %vm897_vm4 = vcmask 261360  }
  0xba   :  { %628 = vst.msk [vmem:[#allocation0] sm:$0xf] %vm627_vm5, %v626_v33   ;;  %vm915_vm5 = vcmask 244960  }
  0xbc   :  { %v644_v34 = vpop.permute.xlu0 %643   ;;  %v662_v35 = vpop.permute.xlu1 %661  }
  0xbd   :  { %646 = vst.msk [vmem:[#allocation0] sm:$0xf] %vm645_vm6, %v644_v34   ;;  %vm933_vm6 = vcmask 228560  }
  0xbe   :  { %664 = vst.msk [vmem:[#allocation0] sm:$0xf] %vm663_vm7, %v662_v35   ;;  %vm951_vm7 = vcmask 212160  }
  0xc0   :  { %v680_v36 = vpop.permute.xlu0 %679   ;;  %v698_v37 = vpop.permute.xlu1 %697  }
  0xc1   :  { %682 = vst.msk [vmem:[#allocation0] sm:$0xf] %vm681_vm8, %v680_v36   ;;  %vm969_vm8 = vcmask 195760  }
  0xc2   :  { %700 = vst.msk [vmem:[#allocation0] sm:$0xf] %vm699_vm9, %v698_v37   ;;  %vm987_vm9 = vcmask 179360  }
  0xc4   :  { %v716_v38 = vpop.permute.xlu0 %715   ;;  %v734_v39 = vpop.permute.xlu1 %733  }
  0xc5   :  { %718 = vst.msk [vmem:[#allocation0] sm:$0xf] %vm717_vm10, %v716_v38   ;;  %vm1005_vm10 = vcmask 162960  }
  0xc6   :  { %736 = vst.msk [vmem:[#allocation0] sm:$0xf] %vm735_vm11, %v734_v39   ;;  %vm1023_vm11 = vcmask 146560  }
  0xc8   :  { %v752_v40 = vpop.permute.xlu0 %751   ;;  %v770_v41 = vpop.permute.xlu1 %769  }
  0xc9   :  { %754 = vst.msk [vmem:[#allocation0] sm:$0xf] %vm753_vm12, %v752_v40   ;;  %vm1041_vm12 = vcmask 130160  }
  0xca   :  { %772 = vst.msk [vmem:[#allocation0] sm:$0xf] %vm771_vm13, %v770_v41   ;;  %vm1059_vm13 = vcmask 113760  }
  0xcc   :  { %v788_v42 = vpop.permute.xlu0 %787   ;;  %v806_v43 = vpop.permute.xlu1 %805  }
  0xcd   :  { %790 = vst.msk [vmem:[#allocation0] sm:$0xf] %vm789_vm14, %v788_v42   ;;  %vm1077_vm14 = vcmask 97360  }
  0xce   :  { %808 = vst.msk [vmem:[#allocation0] sm:$0xf] %vm807_vm15, %v806_v43   ;;  %vm1095_vm15 = vcmask 80960  }
  0xd0   :  { %v824_v44 = vpop.permute.xlu0 %823   ;;  %v842_v45 = vpop.permute.xlu1 %841  }
  0xd1   :  { %826 = vst.msk [vmem:[#allocation0] sm:$0xf] %vm825_vm0, %v824_v44   ;;  %vm1113_vm0 = vcmask 64560  }
  0xd2   :  { %844 = vst.msk [vmem:[#allocation0] sm:$0xf] %vm843_vm1, %v842_v45   ;;  %vm1131_vm1 = vcmask 48160  }
  0xd4   :  { %v860_v46 = vpop.permute.xlu0 %859   ;;  %v878_v47 = vpop.permute.xlu1 %877  }
  0xd5   :  { %862 = vst.msk [vmem:[#allocation0] sm:$0xf] %vm861_vm2, %v860_v46   ;;  %vm1149_vm2 = vcmask 31760  }
  0xd6   :  { %880 = vst.msk [vmem:[#allocation0] sm:$0xf] %vm879_vm3, %v878_v47  }
  0xd8   :  { %v896_v48 = vpop.permute.xlu0 %895   ;;  %v914_v49 = vpop.permute.xlu1 %913  }
  0xd9   :  { %898 = vst.msk [vmem:[#allocation0] sm:$0xf] %vm897_vm4, %v896_v48  }
  0xda   :  { %916 = vst.msk [vmem:[#allocation0] sm:$0xf] %vm915_vm5, %v914_v49  }
  0xdc   :  { %v932_v50 = vpop.permute.xlu0 %931   ;;  %v950_v51 = vpop.permute.xlu1 %949  }
  0xdd   :  { %934 = vst.msk [vmem:[#allocation0] sm:$0xf] %vm933_vm6, %v932_v50  }
  0xde   :  { %952 = vst.msk [vmem:[#allocation0] sm:$0xf] %vm951_vm7, %v950_v51  }
  0xe0   :  { %v968_v52 = vpop.permute.xlu0 %967   ;;  %v986_v53 = vpop.permute.xlu1 %985  }
  0xe1   :  { %970 = vst.msk [vmem:[#allocation0] sm:$0xf] %vm969_vm8, %v968_v52  }
  0xe2   :  { %988 = vst.msk [vmem:[#allocation0] sm:$0xf] %vm987_vm9, %v986_v53  }
  0xe4   :  { %v1004_v54 = vpop.permute.xlu0 %1003   ;;  %v1022_v55 = vpop.permute.xlu1 %1021  }
  0xe5   :  { %1006 = vst.msk [vmem:[#allocation0] sm:$0xf] %vm1005_vm10, %v1004_v54  }
  0xe6   :  { %1024 = vst.msk [vmem:[#allocation0] sm:$0xf] %vm1023_vm11, %v1022_v55  }
  0xe8   :  { %v1040_v56 = vpop.permute.xlu0 %1039   ;;  %v1058_v57 = vpop.permute.xlu1 %1057  }
  0xe9   :  { %1042 = vst.msk [vmem:[#allocation0] sm:$0xf] %vm1041_vm12, %v1040_v56  }
  0xea   :  { %1060 = vst.msk [vmem:[#allocation0] sm:$0xf] %vm1059_vm13, %v1058_v57  }
  0xec   :  { %v1076_v58 = vpop.permute.xlu0 %1075   ;;  %v1094_v59 = vpop.permute.xlu1 %1093  }
  0xed   :  { %1078 = vst.msk [vmem:[#allocation0] sm:$0xf] %vm1077_vm14, %v1076_v58  }
  0xee   :  { %1096 = vst.msk [vmem:[#allocation0] sm:$0xf] %vm1095_vm15, %v1094_v59  }
  0xf0   :  { %v1112_v60 = vpop.permute.xlu0 %1111   ;;  %v1130_v61 = vpop.permute.xlu1 %1129  }
  0xf1   :  { %1114 = vst.msk [vmem:[#allocation0] sm:$0xf] %vm1113_vm0, %v1112_v60  }
  0xf2   :  { %1132 = vst.msk [vmem:[#allocation0] sm:$0xf] %vm1131_vm1, %v1130_v61  }
  0xf4   :  { %v1148_v62 = vpop.permute.xlu0 %1147  }
  0xf5   :  { %1150 = vst.msk [vmem:[#allocation0] sm:$0xf] %vm1149_vm2, %v1148_v62  }
  0xfc   :  { %v1154_v63 = vld [vmem:[#allocation0] sm:$0xf] }
  0xfd   :  { %1156 = vst [vmem:[%s2514_s1] sm:$0xf] %v1154_v63 }

// kernel: crm_forward.1
= control target key start
LH: loop header
LB: loop body
LE: loop exit
PB: predicated region body
PF: predicated region fallthrough
CT: control target
= control target key end

     0   :  { %s33_s0 = inlined_call_operand.vmem [shape: f32[4,128], index: 0, kind: input, shape index: {}]   ;;  %s34_s1 = inlined_call_operand.vmem [shape: f32[4,128], index: 1, kind: output, shape index: {}]  }
   0x1   :  { %v8_v0 = vld [vmem:[%s33_s0] sm:$0xf] }
   0x2   :  { %15 = vtanh.f32 %v8_v0 }
   0xc   :  { %v16_v1 = vpop.eup %15 }
   0xd   :  { %10 = vst [vmem:[%s34_s1] sm:$0xf] %v16_v1 }

// kernel: custom-call
= control target key start
LH: loop header
LB: loop body
LE: loop exit
PB: predicated region body
PF: predicated region fallthrough
CT: control target
= control target key end

     0   :  { %s126_s0 = inlined_call_operand.vmem [shape: f32[2,16,8], index: 0, kind: input, shape index: {}]   ;;  %s127_s1 = inlined_call_operand.vmem [shape: f32[2,16,8], index: 1, kind: input, shape index: {}]   ;;  %s128_s2 = inlined_call_operand.hbm [shape: c64[2,16,8], index: 2, kind: output, shape index: {}]  }
   0x1   :  { %s87_s11 = scalar_lea.hbm %s128_s2, 256 }
   0x2   :  { %4 = vsyncpa [#allocation0], 0  ;;  %s5_s14 = sshll.u32 %s126_s0, 4  ;;  %s6_s14 = int_to_ptr.vmem [resolvable:$true] %s5_s14 }
   0x3   :  { %s18_s15 = scalar_lea.vmem %s6_s14, 256  ;;  %p23_p1 = scmp.lt.s32.totalorder %s6_s14, %s6_s14 }
   0x4   :  { %p19_p0 = scmp.ne.s32.totalorder %s6_s14, %s18_s15  ;;  %p24_p2 = scmp.lt.s32.totalorder %s18_s15, %s18_s15 }
   0x6   :  { %p25_p3 = por %p24_p2, %p23_p1 }
   0x8   :  { %p26_p4 = pnand %p25_p3, %p19_p0 }
   0xa   :  { %29 = shalt.err (!%p26_p4)  }
   0xb   :  { %p31_p5 = scmp.ne.s32.totalorder %s128_s2, %s87_s11  ;;  %s32_s0 = scalar_lea.hbm %s128_s2, 512 }
   0xc   :  { %p33_p6 = scmp.lt.u32.totalorder %s32_s0, %s87_s11  ;;  %p34_p7 = scmp.lt.u32.totalorder %s87_s11, %s128_s2 }
   0xe   :  { %p35_p8 = por %p34_p7, %p33_p6 }
  0x10   :  { %p36_p9 = pnand %p35_p8, %p31_p5 }
  0x12   :  { %39 = shalt.err (!%p36_p9)  }
  0x13   :  { %8 = dma.vmem_to_hbm [thread:$0]  %s6_s14, 256, %s128_s2, [#allocation0] }
  0x14   :  { %65 = dma.done.wait [#allocation0], 256  }
  0x15   :  { %66 = vsyncadd [#allocation0], 4294967040 }
  0x16   :  { %10 = vsyncpa [#allocation0], 1 }
  0x17   :  { %11 = vsyncpa [#allocation1], 0  ;;  %s12_s28 = sshll.u32 %s127_s1, 4  ;;  %s13_s28 = int_to_ptr.vmem [resolvable:$true] %s12_s28 }
  0x18   :  { %s40_s29 = scalar_lea.vmem %s13_s28, 256  ;;  %p45_p11 = scmp.lt.s32.totalorder %s13_s28, %s13_s28 }
  0x19   :  { %p41_p10 = scmp.ne.s32.totalorder %s13_s28, %s40_s29  ;;  %p46_p12 = scmp.lt.s32.totalorder %s40_s29, %s40_s29 }
  0x1b   :  { %p47_p13 = por %p46_p12, %p45_p11 }
  0x1d   :  { %p48_p0 = pnand %p47_p13, %p41_p10 }
  0x1f   :  { %51 = shalt.err (!%p48_p0)  }
  0x20   :  { %p53_p1 = scmp.ne.s32.totalorder %s87_s11, %s32_s0  ;;  %p56_p2 = scmp.lt.u32.totalorder %s32_s0, %s32_s0 }
  0x22   :  { %p57_p3 = por %p56_p2, %p34_p7 }
  0x24   :  { %p59_p4 = por %p57_p3, %p33_p6 }
  0x26   :  { %p60_p5 = pnand %p59_p4, %p53_p1 }
  0x28   :  { %63 = shalt.err (!%p60_p5)  }
  0x29   :  { %15 = dma.vmem_to_hbm [thread:$0]  %s13_s28, 256, %s87_s11, [#allocation1] }
  0x2a   :  { %67 = dma.done.wait [#allocation1], 256  }
  0x2b   :  { %68 = vsyncadd [#allocation1], 4294967040 }
  0x2c   :  { %17 = vsyncpa [#allocation1], 1 }

</bundles_post_ra>
